<compile_context>
chip_gen: v6e
topology: v6e:2x2x1
jax: 0.10.0
libtpu: 0.0.40
codegen_flags: <defaults>
</compile_context>

<pallas_src>
import jax
import jax.numpy as jnp
from jax.experimental import pallas as pl
from jax.experimental.pallas import tpu as pltpu


# --------------------------------------------------------------------------
# Small helpers
# --------------------------------------------------------------------------
def _round_up(n, m):
    return (n + m - 1) // m * m


def _pick_tile(dim, cap, align=128):
    """Largest multiple of `align` that is <= cap and divides `dim`."""
    t = min(cap, dim)
    t = max((t // align) * align, align)
    while t > align and dim % t != 0:
        t -= align
    return t


def _pick_tm(T, cap):
    """Row tile: multiple of 128, <= cap, minimizing padded-row waste
    (ties broken toward the largest tile)."""
    hi = max(128, min(cap, _round_up(T, 128)))
    best_tm, best_tp = 128, _round_up(T, 128)
    t = 128
    while t <= hi:
        tp = _round_up(T, t)
        if tp < best_tp or (tp == best_tp and t > best_tm):
            best_tm, best_tp = t, tp
        t += 128
    return best_tm


def _working_set_bytes(tm, tn, tk):
    """Double-buffered VMEM footprint estimate for one grid step."""
    return (2 * tm * tk * 2      # x  (bf16, MXU stream)
            + 2 * tk * tn * 2    # w  (bf16)
            + 2 * tm * tn * 4    # x  (f32, residual stream)
            + 2 * tn * 4         # bias (f32)
            + 2 * tm * tn * 4)   # out (f32)


def _tpu_generation():
    try:
        kind = jax.devices()[0].device_kind.lower()
    except Exception:
        return "unknown"
    if "v7" in kind:
        return "v7x"
    if "v6" in kind or "trillium" in kind:
        return "v6e"
    if "v5 lite" in kind or "v5lite" in kind or "v5e" in kind:
        return "v5e"
    if "v5" in kind:
        return "v5p"
    return "unknown"


#               tm_cap  tn_cap  tk_cap  vmem_limit_bytes   (per perf review)
_TILE_CONFIG = {
    "v5e":     (512,    512,    1024,   32 << 20),
    "v5p":     (512,    512,    1024,   48 << 20),
    "v6e":     (1024,   1024,   1024,   64 << 20),
    "v7x":     (512,    1024,   1024,   48 << 20),   # 64 MiB physical VMEM
    "unknown": (512,    512,    512,    48 << 20),
}
_MXU_WIDTH = {"v6e": 256, "v7x": 256}


# --------------------------------------------------------------------------
# Kernels
# --------------------------------------------------------------------------
def _residual_linear_kernel_fullk(xmm_ref, w_ref, b_ref, xres_ref, o_ref):
    # Whole reduction in one step: xmm (TM, Hp) bf16 | w (Hp, TN) bf16
    # b (1, TN) f32 | xres (TM, TN) f32 | o (TM, TN) f32.
    y = jnp.dot(xmm_ref[...], w_ref[...], preferred_element_type=jnp.float32)
    o_ref[...] = (y + b_ref[...] + xres_ref[...]).astype(o_ref.dtype)


def _residual_linear_kernel_kgrid(xmm_ref, w_ref, b_ref, xres_ref, o_ref):
    # K-tiled reduction. o_ref's block index is K-invariant, so it stays
    # VMEM-resident across the K axis and we accumulate into it directly
    # (no scratch). K MUST remain the innermost, "arbitrary" grid axis.
    k = pl.program_id(2)

    @pl.when(k == 0)
    def _init():
        o_ref[...] = jnp.zeros_like(o_ref)

    o_ref[...] += jnp.dot(xmm_ref[...], w_ref[...],
                          preferred_element_type=jnp.float32)

    @pl.when(k == pl.num_programs(2) - 1)
    def _finalize():
        o_ref[...] += b_ref[...] + xres_ref[...]


# --------------------------------------------------------------------------
# Wrapper: parameters padded / cast ONCE at construction
# --------------------------------------------------------------------------
class ResidualLinearPallas:
    """Fused Pallas implementation of Residual(Linear): y = x + (x @ W + b)."""

    def __init__(self, w, b):
        H, H2 = w.shape
        assert H == H2 and b.shape == (H,)
        self.H = H

        gen = _tpu_generation()
        self.tm_cap, self.tn_cap, self.tk_cap, self.vmem_limit = \
            _TILE_CONFIG.get(gen, _TILE_CONFIG["unknown"])
        mxu_w = _MXU_WIDTH.get(gen, 128)

        # Pad H: multiple of 256 on 256-wide-MXU chips (v6e/v7x) so N/K tiles
        # don't collapse to 128-wide and leave half the MXU idle.
        if H <= 128:
            Hp = _round_up(H, 128)
        else:
            Hp = _round_up(H, mxu_w)
        self.Hp = Hp

        # Hoisted (once-per-module) pad + cast of the static parameters.
        self.w_pad = jnp.pad(w, ((0, Hp - H), (0, Hp - H))).astype(jnp.bfloat16)
        self.b_pad = jnp.pad(b, (0, Hp - H)).astype(jnp.float32).reshape(1, Hp)

    # ----------------------------------------------------------------------
    def __call__(self, x):
        lead = x.shape[:-1]
        T = 1
        for d in lead:
            T *= d
        out = self._fused(x.reshape(T, self.H))
        return out.reshape(*lead, self.H)

    # ----------------------------------------------------------------------
    def _fused(self, x2):
        T, H = x2.shape
        Hp = self.Hp

        # ---- tile sizing -------------------------------------------------
        tm = _pick_tm(T, self.tm_cap)
        tn = _pick_tile(Hp, self.tn_cap)
        budget = int(0.75 * self.vmem_limit)

        if _working_set_bytes(tm, tn, Hp) <= budget:
            tk = Hp                         # whole reduction fits: drop K axis
        else:
            tk = _pick_tile(Hp, self.tk_cap)
            # Shrink tk, then tn, then tm until the working set fits.
            while _working_set_bytes(tm, tn, tk) > budget:
                if tk > 128:
                    nk = _pick_tile(Hp, tk - 128)
                    if nk < tk:
                        tk = nk
                        continue
                if tn > 128:
                    nn = _pick_tile(Hp, tn - 128)
                    if nn < tn:
                        tn = nn
                        continue
                if tm > 128:
                    tm -= 128
                    continue
                break
        Tp = _round_up(T, tm)

        # ---- operand padding (per-call; activations only) ----------------
        x_pad = jnp.pad(x2.astype(jnp.float32),
                        ((0, Tp - T), (0, Hp - H)))           # f32 residual
        x_mm = x_pad.astype(jnp.bfloat16)                     # bf16 MXU feed

        flops = 2 * Tp * Hp * Hp
        bytes_accessed = (x_mm.size * 2 + x_pad.size * 4 + self.w_pad.size * 2
                          + self.b_pad.size * 4 + Tp * Hp * 4)
        cost = pl.CostEstimate(flops=flops, transcendentals=0,
                               bytes_accessed=bytes_accessed)

        if tk == Hp:
            # -------- 2-D grid: no K axis, no accumulator ------------------
            out = pl.pallas_call(
                _residual_linear_kernel_fullk,
                out_shape=jax.ShapeDtypeStruct((Tp, Hp), jnp.float32),
                grid_spec=pltpu.PrefetchScalarGridSpec(
                    num_scalar_prefetch=0,
                    grid=(Tp // tm, Hp // tn),
                    in_specs=[
                        pl.BlockSpec((tm, Hp), lambda ti, ni: (ti, 0)),   # x bf16
                        pl.BlockSpec((Hp, tn), lambda ti, ni: (0, ni)),   # w bf16
                        pl.BlockSpec((1, tn), lambda ti, ni: (0, ni)),    # bias
                        pl.BlockSpec((tm, tn), lambda ti, ni: (ti, ni)),  # x f32 residual
                    ],
                    out_specs=pl.BlockSpec((tm, tn), lambda ti, ni: (ti, ni)),
                ),
                compiler_params=pltpu.CompilerParams(
                    dimension_semantics=("parallel", "parallel"),
                    vmem_limit_bytes=self.vmem_limit),
                cost_estimate=cost,
            )(x_mm, self.w_pad, self.b_pad, x_pad)
        else:
            # -------- 3-D grid: K innermost ("arbitrary"), accumulate in o_ref
            out = pl.pallas_call(
                _residual_linear_kernel_kgrid,
                out_shape=jax.ShapeDtypeStruct((Tp, Hp), jnp.float32),
                grid_spec=pltpu.PrefetchScalarGridSpec(
                    num_scalar_prefetch=0,
                    grid=(Tp // tm, Hp // tn, Hp // tk),
                    in_specs=[
                        pl.BlockSpec((tm, tk), lambda ti, ni, ki: (ti, ki)),   # x bf16
                        pl.BlockSpec((tk, tn), lambda ti, ni, ki: (ki, ni)),   # w bf16
                        pl.BlockSpec((1, tn), lambda ti, ni, ki: (0, ni)),     # bias
                        pl.BlockSpec((tm, tn), lambda ti, ni, ki: (ti, ni)),   # residual
                    ],
                    out_specs=pl.BlockSpec((tm, tn), lambda ti, ni, ki: (ti, ni)),
                ),
                compiler_params=pltpu.CompilerParams(
                    dimension_semantics=("parallel", "parallel", "arbitrary"),
                    vmem_limit_bytes=self.vmem_limit),
                cost_estimate=cost,
            )(x_mm, self.w_pad, self.b_pad, x_pad)

        return out[:T, :H].astype(x2.dtype)


class Residual:
    """JAX mirror of the PyTorch Residual module: forward(x) = x + fn(x)."""

    def __init__(self, fn):
        self.fn = fn

    def __call__(self, x):
        return x + self.fn(x)


if __name__ == "__main__":
    key = jax.random.PRNGKey(0)
    k_x, k_w, k_b = jax.random.split(key, 3)

    batch, seq, hidden = 2, 8, 32
    x3 = jax.random.normal(k_x, (batch, seq, hidden), dtype=jnp.float32)

    # Deterministic parameter init (like nn.Linear: small uniform)
    bound = 1.0 / (hidden ** 0.5)
    w = jax.random.uniform(k_w, (hidden, hidden), minval=-bound, maxval=bound,
                           dtype=jnp.float32)
    b = jax.random.uniform(k_b, (hidden,), minval=-bound, maxval=bound,
                           dtype=jnp.float32)

    # Fused Pallas path: residual + linear in one kernel; weights padded/cast once.
    fused = ResidualLinearPallas(w, b)
    out = fused(x3)
    jax.block_until_ready(out)

    # Reference 1: exact module semantics (f32 matmul). Loose tolerance because
    # the kernel feeds bf16 into the MXU (f32 accumulation).
    res_ref = Residual(lambda t: t @ w + b)
    ref_f32 = res_ref(x3)
    assert out.shape == ref_f32.shape
    assert jnp.allclose(out, ref_f32, atol=5e-2, rtol=5e-2)

    # Reference 2: same bf16 input rounding as the kernel -> tight tolerance.
    xb = x3.astype(jnp.bfloat16).astype(jnp.float32)
    wb = w.astype(jnp.bfloat16).astype(jnp.float32)
    ref_bf16 = x3 + (xb @ wb + b)
    assert jnp.allclose(out, ref_bf16, atol=1e-4, rtol=1e-4)

    print("KERNEL_OK")
</pallas_src>

<mosaic_0001>
module attributes {stable_mosaic.version = 11 : i64} {
  func.func @_residual_linear_kernel_fullk(%arg0: i32, %arg1: i32, %arg2: memref<128x128xbf16, #tpu.memory_space<vmem>>, %arg3: memref<128x128xbf16, #tpu.memory_space<vmem>>, %arg4: memref<1x128xf32, #tpu.memory_space<vmem>>, %arg5: memref<128x128xf32, #tpu.memory_space<vmem>>, %arg6: memref<128x128xf32, #tpu.memory_space<vmem>>) attributes {dimension_semantics = [#tpu.dimension_semantics<parallel>, #tpu.dimension_semantics<parallel>], iteration_bounds = array<i64: 1, 1>, scalar_prefetch = 0 : i64, scratch_operands = 0 : i64, tpu.core_type = #tpu.core_type<tc>, window_params = [{transform_indices = @transform_0, window_bounds = array<i64: 128, 128>}, {transform_indices = @transform_1, window_bounds = array<i64: 128, 128>}, {transform_indices = @transform_2, window_bounds = array<i64: 1, 128>}, {transform_indices = @transform_3, window_bounds = array<i64: 128, 128>}, {transform_indices = @transform_4, window_bounds = array<i64: 128, 128>}]} {
    %c0 = arith.constant 0 : index
    %c0_0 = arith.constant 0 : index
    %0 = vector.load %arg2[%c0, %c0_0] : memref<128x128xbf16, #tpu.memory_space<vmem>>, vector<128x128xbf16>
    %c0_1 = arith.constant 0 : index
    %c0_2 = arith.constant 0 : index
    %1 = vector.load %arg3[%c0_1, %c0_2] : memref<128x128xbf16, #tpu.memory_space<vmem>>, vector<128x128xbf16>
    %cst = arith.constant dense<0.000000e+00> : vector<128x128xf32>
    %2 = tpu.matmul %0, %1, %cst {dimension_numbers = #tpu.dot_dimension_numbers<[1], [0], [0], [1], [0, 0, 1, 1], [], []>} : vector<128x128xbf16>, vector<128x128xbf16>, vector<128x128xf32> -> vector<128x128xf32>
    %c0_3 = arith.constant 0 : index
    %c0_4 = arith.constant 0 : index
    %3 = vector.load %arg4[%c0_3, %c0_4] : memref<1x128xf32, #tpu.memory_space<vmem>>, vector<1x128xf32>
    %4 = vector.broadcast %3 : vector<1x128xf32> to vector<128x128xf32>
    %5 = arith.addf %2, %4 : vector<128x128xf32>
    %c0_5 = arith.constant 0 : index
    %c0_6 = arith.constant 0 : index
    %6 = vector.load %arg5[%c0_5, %c0_6] : memref<128x128xf32, #tpu.memory_space<vmem>>, vector<128x128xf32>
    %7 = arith.addf %5, %6 : vector<128x128xf32>
    %c0_7 = arith.constant 0 : index
    %c0_8 = arith.constant 0 : index
    %8 = vector.load %arg6[%c0_7, %c0_8] : memref<128x128xf32, #tpu.memory_space<vmem>>, vector<128x128xf32>
    tpu.vector_store %arg6[%c0_7, %c0_8], %7 {strides = array<i32>} : memref<128x128xf32, #tpu.memory_space<vmem>>, vector<128x128xf32>,
    return
  }
  func.func @transform_0(%arg0: i32, %arg1: i32) -> (i32, i32) {
    %c0_i32 = arith.constant 0 : i32
    %c0_i32_0 = arith.constant 0 : i32
    return %arg0, %c0_i32 : i32, i32
  }
  func.func @transform_1(%arg0: i32, %arg1: i32) -> (i32, i32) {
    %c0_i32 = arith.constant 0 : i32
    %c0_i32_0 = arith.constant 0 : i32
    return %c0_i32, %arg1 : i32, i32
  }
  func.func @transform_2(%arg0: i32, %arg1: i32) -> (i32, i32) {
    %c0_i32 = arith.constant 0 : i32
    %c0_i32_0 = arith.constant 0 : i32
    return %c0_i32, %arg1 : i32, i32
  }
  func.func @transform_3(%arg0: i32, %arg1: i32) -> (i32, i32) {
    %c0_i32 = arith.constant 0 : i32
    return %arg0, %arg1 : i32, i32
  }
  func.func @transform_4(%arg0: i32, %arg1: i32) -> (i32, i32) {
    %c0_i32 = arith.constant 0 : i32
    return %arg0, %arg1 : i32, i32
  }
}

</mosaic_0001>

<bundles_post_ra>
// kernel: tpu_custom_call.1
= control target key start
LH: loop header
LB: loop body
LE: loop exit
PB: predicated region body
PF: predicated region fallthrough
CT: control target
= control target key end

     0   :  { %9 = vsyncpa [#allocation3], 0  ;;  %s621_s0 = inlined_call_operand.hbm [shape: bf16[128,128], index: 0, kind: input, shape index: {}]   ;;  %s622_s1 = inlined_call_operand.hbm [shape: bf16[128,128], index: 1, kind: input, shape index: {}]   ;;  %s623_s2 = inlined_call_operand.vmem [shape: f32[1,128], index: 2, kind: input, shape index: {}]   ;;  %s624_s3 = inlined_call_operand.hbm [shape: f32[128,128], index: 3, kind: input, shape index: {}]   ;;  %s625_s4 = inlined_call_operand.hbm [shape: f32[128,128], index: 4, kind: output, shape index: {}]  }
   0x1   :  { %10 = vsyncpa [#allocation6], 0 }
   0x2   :  { %11 = vsyncpa [#allocation4], 0  ;;  %s549_s15 = smov [#allocation5]   ;;  %s550_s17 = smov [#allocation2]  }
   0x3   :  { %s29_s16 = sshll.u32 %s549_s15, 4  ;;  %s17_s18 = sshll.u32 %s550_s17, 4  ;;  %s30_s16 = int_to_ptr.vmem [resolvable:$true] %s29_s16  ;;  %s18_s18 = int_to_ptr.vmem [resolvable:$true] %s17_s18 }
   0x4   :  { %s471_s19 = scalar_lea.vmem %s30_s16, 1024  ;;  %p476_p1 = scmp.lt.s32.totalorder %s30_s16, %s30_s16 }
   0x5   :  { %p472_p0 = scmp.ne.s32.totalorder %s30_s16, %s471_s19  ;;  %p477_p2 = scmp.lt.s32.totalorder %s471_s19, %s471_s19 }
   0x7   :  { %p478_p3 = por %p477_p2, %p476_p1 }
   0x9   :  { %p479_p4 = pnand %p478_p3, %p472_p0 }
   0xb   :  { %482 = shalt.err (!%p479_p4)
}
   0xc   :  { %s551_s20 = smov 64   ;;  %s552_s21 = smov 4  }
   0xd   :  { %35 = dma.hbm_to_vmem [thread:$0]  %s622_s1, 1024, %s30_s16, [#allocation6], %s551_s20, %s551_s20, %s552_s21  }
   0xe   :  { %s491_s24 = scalar_lea.vmem %s18_s18, 1024  ;;  %p496_p6 = scmp.lt.s32.totalorder %s18_s18, %s18_s18 }
   0xf   :  { %p492_p5 = scmp.ne.s32.totalorder %s18_s18, %s491_s24  ;;  %p497_p7 = scmp.lt.s32.totalorder %s491_s24, %s491_s24 }
  0x11   :  { %p498_p8 = por %p497_p7, %p496_p6 }
  0x13   :  { %p499_p9 = pnand %p498_p8, %p492_p5 }
  0x15   :  { %502 = shalt.err (!%p499_p9)
}
  0x16   :  { %23 = dma.hbm_to_vmem [thread:$0]  %s621_s0, 1024, %s18_s18, [#allocation3], %s551_s20, %s551_s20, %s552_s21  }
  0x17   :  { %s553_s27 = smov [#allocation7]  }
  0x18   :  { %s43_s28 = sshll.u32 %s553_s27, 4  ;;  %s44_s28 = int_to_ptr.vmem [resolvable:$true] %s43_s28 }
  0x19   :  { %s511_s29 = scalar_lea.vmem %s44_s28, 2048  ;;  %p516_p11 = scmp.lt.s32.totalorder %s44_s28, %s44_s28 }
  0x1a   :  { %p512_p10 = scmp.ne.s32.totalorder %s44_s28, %s511_s29  ;;  %p517_p12 = scmp.lt.s32.totalorder %s511_s29, %s511_s29 }
  0x1c   :  { %p518_p13 = por %p517_p12, %p516_p11 }
  0x1e   :  { %p519_p0 = pnand %p518_p13, %p512_p10 }
  0x20   :  { %522 = shalt.err (!%p519_p0)
}
  0x21   :  { %s554_s1 = smov 128   ;;  %s555_s30 = smov 8  }
  0x22   :  { %49 = dma.hbm_to_vmem [thread:$0]  %s624_s3, 2048, %s44_s28, [#allocation6], %s554_s1, %s554_s1, %s555_s30  }
  0x23   :  { %543 = dma.done.wait [#allocation3], 1024  }
  0x24   :  { %544 = vsyncadd [#allocation3], 4294966272 }
  0x25   :  { %545 = dma.done.wait [#allocation6], 3072  }
  0x26   :  { %546 = vsyncadd [#allocation6], 4294964224  ;;  %v447_v0 = vld [vmem:[#allocation5 + $0x38] sm:$0xff]   ;;  %v448_v1 = vld [vmem:[#allocation5 + $0x30] sm:$0xff]  }
  0x27   :  { %391 = vmatprep.subr.bf16.mxu0 %v447_v0  ;;  %423 = vmatprep.subr.bf16.mxu1 %v447_v0  ;;  %v449_v2 = vld [vmem:[#allocation5 + $0x28] sm:$0xff]   ;;  %v450_v3 = vld [vmem:[#allocation5 + $0x20] sm:$0xff]   ;;  %v451_v6 = vld [vmem:[#allocation5 + $0x18] sm:$0xff]  }
  0x28   :  { %392 = vmatpush3.bf16.msra.mxu0 %v447_v0  ;;  %431 = vmatpush3.bf16.msra.mxu1 %v447_v0  ;;  %v455_v4 = vld [vmem:[#allocation2] sm:$0xff]   ;;  %v452_v7 = vld [vmem:[#allocation5 + $0x10] sm:$0xff]   ;;  %v453_v8 = vld [vmem:[#allocation5 + $0x8] sm:$0xff]  }
  0x29   :  { %393 = vmatprep.subr.bf16.mxu0 %v448_v1  ;;  %424 = vmatprep.subr.bf16.mxu1 %v448_v1  ;;  %v456_v5 = vld [vmem:[#allocation2 + $0x20] sm:$0xff]   ;;  %v457_v10 = vld [vmem:[#allocation2 + $0x8] sm:$0xff]   ;;  %v459_v12 = vld [vmem:[#allocation2 + $0x10] sm:$0xff]  }
  0x2a   :  { %407 = vmatprep.mubr.bf16.mxu0 %v455_v4  ;;  %415 = vmatprep.mubr.bf16.mxu1 %v456_v5  ;;  %v454_v9 = vld [vmem:[#allocation5] sm:$0xff]   ;;  %v458_v11 = vld [vmem:[#allocation2 + $0x28] sm:$0xff]   ;;  %v460_v13 = vld [vmem:[#allocation2 + $0x30] sm:$0xff]  }
  0x2b   :  { %v461_v14 = vld [vmem:[#allocation2 + $0x18] sm:$0xff]   ;;  %v597_v16 = vld [vmem:[%s623_s2] ss:$0 sm:$0xff]  ;;  %v294_v18 = vld [vmem:[#allocation7 + $0x10] sm:$0xff]  ;;  %s556_s2 = smov [#allocation8]  }
  0x2c   :  { %394 = vmatpush3.bf16.msra.mxu0 %v448_v1  ;;  %432 = vmatpush3.bf16.msra.mxu1 %v448_v1  ;;  %v462_v15 = vld [vmem:[#allocation2 + $0x38] sm:$0xff]   ;;  %v302_v20 = vld [vmem:[#allocation7 + $0x50] sm:$0xff]  ;;  %v292_v24 = vld [vmem:[#allocation7] sm:$0xff]  ;;  %s345_s7 = sshll.u32 %s556_s2, 4  ;;  %s346_s7 = int_to_ptr.vmem [resolvable:$true] %s345_s7 }
  0x2d   :  { %395 = vmatprep.subr.bf16.mxu0 %v449_v2  ;;  %425 = vmatprep.subr.bf16.mxu1 %v449_v2  ;;  %v300_v26 = vld [vmem:[#allocation7 + $0x40] sm:$0xff]  ;;  %v295_v32 = vld [vmem:[#allocation7 + $0x18] sm:$0xff]  ;;  %v293_v40 = vld [vmem:[#allocation7 + $0x8] sm:$0xff]  ;;  %s523_s8 = scalar_lea.vmem %s346_s7, 2048  ;;  %p528_p2 = scmp.lt.s32.totalorder %s346_s7, %s346_s7 }
  0x2e   :  { %v303_v34 = vld [vmem:[#allocation7 + $0x58] sm:$0xff]  ;;  %v301_v42 = vld [vmem:[#allocation7 + $0x48] sm:$0xff]  ;;  %v298_v48 = vld [vmem:[#allocation7 + $0x30] sm:$0xff]  ;;  %p524_p1 = scmp.ne.s32.totalorder %s346_s7, %s523_s8  ;;  %p529_p3 = scmp.lt.s32.totalorder %s523_s8, %s523_s8 }
  0x2f   :  { %v306_v50 = vld [vmem:[#allocation7 + $0x70] sm:$0xff]  ;;  %v296_v56 = vld [vmem:[#allocation7 + $0x20] sm:$0xff]  ;;  %v299_v0 = vld [vmem:[#allocation7 + $0x38] sm:$0xff] }
  0x30   :  { %396 = vmatpush3.bf16.msra.mxu0 %v449_v2  ;;  %433 = vmatpush3.bf16.msra.mxu1 %v449_v2  ;;  %v304_v58 = vld [vmem:[#allocation7 + $0x60] sm:$0xff]  ;;  %v307_v2 = vld [vmem:[#allocation7 + $0x78] sm:$0xff]  ;;  %p530_p4 = por %p529_p3, %p528_p2 }
  0x31   :  { %397 = vmatprep.subr.bf16.mxu0 %v450_v3  ;;  %426 = vmatprep.subr.bf16.mxu1 %v450_v3 }
  0x32   :  { %p531_p5 = pnand %p530_p4, %p524_p1 }
  0x34   :  { %398 = vmatpush3.bf16.msra.mxu0 %v450_v3  ;;  %434 = vmatpush3.bf16.msra.mxu1 %v450_v3 }
  0x35   :  { %399 = vmatprep.subr.bf16.mxu0 %v451_v6  ;;  %427 = vmatprep.subr.bf16.mxu1 %v451_v6 }
  0x38   :  { %400 = vmatpush3.bf16.msra.mxu0 %v451_v6  ;;  %435 = vmatpush3.bf16.msra.mxu1 %v451_v6 }
  0x39   :  { %401 = vmatprep.subr.bf16.mxu0 %v452_v7  ;;  %428 = vmatprep.subr.bf16.mxu1 %v452_v7 }
  0x3c   :  { %402 = vmatpush3.bf16.msra.mxu0 %v452_v7  ;;  %436 = vmatpush3.bf16.msra.mxu1 %v452_v7 }
  0x3d   :  { %403 = vmatprep.subr.bf16.mxu0 %v453_v8  ;;  %429 = vmatprep.subr.bf16.mxu1 %v453_v8 }
  0x40   :  { %404 = vmatpush3.bf16.msra.mxu0 %v453_v8  ;;  %437 = vmatpush3.bf16.msra.mxu1 %v453_v8  ;;  %v297_v8 = vld [vmem:[#allocation7 + $0x28] sm:$0xff] }
  0x41   :  { %405 = vmatprep.subr.bf16.mxu0 %v454_v9  ;;  %430 = vmatprep.subr.bf16.mxu1 %v454_v9 }
  0x44   :  { %406 = vmatpush3.bf16.msra.mxu0 %v454_v9  ;;  %438 = vmatpush3.bf16.msra.mxu1 %v454_v9 }
  0x47   :  { %408 = vmatmul.mubr.bf16.vlgmr.msra.gmra.mxu0 %v457_v10  ;;  %416 = vmatmul.mubr.bf16.vlgmr.msra.gmra.mxu1 %v458_v11  ;;  %v305_v10 = vld [vmem:[#allocation7 + $0x68] sm:$0xff] }
  0x48   :  { %411 = vmatprep.mubr.bf16.mxu0 %v459_v12  ;;  %419 = vmatprep.mubr.bf16.mxu1 %v460_v13 }
  0x4f   :  { %412 = vmatmul.mubr.bf16.gmra.mxu0 %v461_v14  ;;  %420 = vmatmul.mubr.bf16.gmra.mxu1 %v462_v15 }
 0x107   :  { %v409_v17 = vpop.f32.mrf.mxu0  ;;  %v417_v19 = vpop.f32.mrf.mxu1 }
 0x108   :  { %v238_v21 = vadd.f32 %v409_v17, %v597_v16  ;;  %v270_v22 = vadd.f32 %v417_v19, %v597_v16 }
 0x109   :  { %v229_v23 = vpop.f32.mrf.mxu0  ;;  %v261_v25 = vpop.f32.mrf.mxu1 }
 0x10a   :  { %v310_v27 = vadd.f32 %v294_v18, %v238_v21  ;;  %v318_v28 = vadd.f32 %v302_v20, %v270_v22  ;;  %v230_v29 = vadd.f32 %v597_v16, %v229_v23  ;;  %v262_v30 = vadd.f32 %v597_v16, %v261_v25 }
 0x10b   :  { %v410_v31 = vpop.f32.mrf.mxu0  ;;  %v418_v33 = vpop.f32.mrf.mxu1 }
 0x10c   :  { %326 = vst [vmem:[#allocation8 + $0x10] sm:$0xff] %v310_v27  ;;  %334 = vst [vmem:[#allocation8 + $0x50] sm:$0xff] %v318_v28  ;;  %v308_v35 = vadd.f32 %v292_v24, %v230_v29  ;;  %v316_v36 = vadd.f32 %v300_v26, %v262_v30  ;;  %v241_v37 = vadd.f32 %v410_v31, %v597_v16 }
 0x10d   :  { %v273_v38 = vadd.f32 %v418_v33, %v597_v16  ;;  %v232_v39 = vpop.f32.mrf.mxu0  ;;  %v264_v41 = vpop.f32.mrf.mxu1 }
 0x10e   :  { %324 = vst [vmem:[#allocation8] sm:$0xff] %v308_v35  ;;  %332 = vst [vmem:[#allocation8 + $0x40] sm:$0xff] %v316_v36  ;;  %v311_v43 = vadd.f32 %v295_v32, %v241_v37  ;;  %v233_v45 = vadd.f32 %v597_v16, %v232_v39  ;;  %v265_v46 = vadd.f32 %v597_v16, %v264_v41 }
 0x10f   :  { %v319_v44 = vadd.f32 %v303_v34, %v273_v38  ;;  %v413_v47 = vpop.f32.mrf.mxu0  ;;  %v421_v49 = vpop.f32.mrf.mxu1 }
 0x110   :  { %327 = vst [vmem:[#allocation8 + $0x18] sm:$0xff] %v311_v43  ;;  %v309_v51 = vadd.f32 %v293_v40, %v233_v45  ;;  %v317_v52 = vadd.f32 %v301_v42, %v265_v46  ;;  %v254_v53 = vadd.f32 %v413_v47, %v597_v16  ;;  %v286_v54 = vadd.f32 %v421_v49, %v597_v16 }
 0x111   :  { %335 = vst [vmem:[#allocation8 + $0x58] sm:$0xff] %v319_v44  ;;  %v245_v55 = vpop.f32.mrf.mxu0  ;;  %v277_v57 = vpop.f32.mrf.mxu1 }
 0x112   :  { %325 = vst [vmem:[#allocation8 + $0x8] sm:$0xff] %v309_v51  ;;  %333 = vst [vmem:[#allocation8 + $0x48] sm:$0xff] %v317_v52  ;;  %v314_v59 = vadd.f32 %v298_v48, %v254_v53  ;;  %v322_v60 = vadd.f32 %v306_v50, %v286_v54  ;;  %v246_v61 = vadd.f32 %v597_v16, %v245_v55 }
 0x113   :  { %v278_v62 = vadd.f32 %v597_v16, %v277_v57  ;;  %v414_v63 = vpop.f32.mrf.mxu0  ;;  %v422_v1 = vpop.f32.mrf.mxu1 }
 0x114   :  { %330 = vst [vmem:[#allocation8 + $0x30] sm:$0xff] %v314_v59  ;;  %338 = vst [vmem:[#allocation8 + $0x70] sm:$0xff] %v322_v60  ;;  %v312_v3 = vadd.f32 %v296_v56, %v246_v61  ;;  %v257_v5 = vadd.f32 %v414_v63, %v597_v16  ;;  %v289_v6 = vadd.f32 %v422_v1, %v597_v16 }
 0x115   :  { %v320_v4 = vadd.f32 %v304_v58, %v278_v62  ;;  %v248_v7 = vpop.f32.mrf.mxu0  ;;  %v280_v9 = vpop.f32.mrf.mxu1 }
 0x116   :  { %328 = vst [vmem:[#allocation8 + $0x20] sm:$0xff] %v312_v3  ;;  %v315_v11 = vadd.f32 %v299_v0, %v257_v5  ;;  %v323_v12 = vadd.f32 %v307_v2, %v289_v6  ;;  %v249_v13 = vadd.f32 %v597_v16, %v248_v7  ;;  %v281_v14 = vadd.f32 %v597_v16, %v280_v9 }
 0x117   :  { %336 = vst [vmem:[#allocation8 + $0x60] sm:$0xff] %v320_v4 }
 0x118   :  { %331 = vst [vmem:[#allocation8 + $0x38] sm:$0xff] %v315_v11  ;;  %339 = vst [vmem:[#allocation8 + $0x78] sm:$0xff] %v323_v12  ;;  %v313_v15 = vadd.f32 %v297_v8, %v249_v13  ;;  %v321_v17 = vadd.f32 %v305_v10, %v281_v14 }
 0x11a   :  { %329 = vst [vmem:[#allocation8 + $0x28] sm:$0xff] %v313_v15  ;;  %337 = vst [vmem:[#allocation8 + $0x68] sm:$0xff] %v321_v17 }
 0x11b   :  { %534 = shalt.err (!%p531_p5)
}
 0x11c   :  { %351 = dma.vmem_to_hbm [thread:$0]  %s346_s7, 2048, %s625_s4, [#allocation4], %s554_s1, %s554_s1, %s555_s30  }
 0x11d   :  { %547 = dma.done.wait [#allocation4], 2048  }
 0x11e   :  { %548 = vsyncadd [#allocation4], 4294965248 }
 0x11f   :  { %355 = vsyncpa [#allocation3], 1 }
 0x120   :  { %356 = vsyncpa [#allocation6], 1 }
 0x121   :  { %357 = vsyncpa [#allocation4], 1 }

</bundles_post_ra>
